<compile_context>
chip_gen: v6e
topology: v6e:2x2x1
jax: 0.10.0
libtpu: 0.0.40
codegen_flags: <defaults>
</compile_context>

<pallas_src>
import jax
import jax.numpy as jnp
from jax.experimental import pallas as pl
from jax.experimental.pallas import tpu as pltpu

D_MSG, D_H1, D_H2 = 10, 5, 5   # MPL_1 out, lin1 out, lin2 out
LANE = 128                     # lane width for the padded lin3 / output


def model6_kernel(
    edge_feat_ref,     # [TILE_E, Dcat] bf16  concat([x[src], edge_attr]) tile
    dst_ref,           # [1, TILE_E]    int32 destination node per edge (N = padded)
    batch_ref,         # [1, N]         int32 graph id per node (resident)
    wm1_ref, bm1_ref,  # fused MPL_1 message linear + lin1: [Dcat,5] bf16, [1,5] f32
    b1_ref,            # lin1 bias [1,5] f32
    w2_ref, b2_ref,    # lin2: [5,5] f32, [1,5] f32
    w3_ref, b3_ref,    # lin3 lane-padded: [5,128] f32, [1,128] f32
    out_ref,           # [G, 128] f32 (only column 0 meaningful)
    acc_ref,           # VMEM scratch [N, 5] f32 — node accumulator (w1 pushed through scatter)
):
    f32 = jnp.float32
    bf16 = jnp.bfloat16
    e = pl.program_id(0)

    n_nodes = acc_ref.shape[0]
    tile_e = edge_feat_ref.shape[0]
    n_graphs = out_ref.shape[0]

    @pl.when(e == 0)
    def _init():
        acc_ref[...] = jnp.zeros_like(acc_ref)

    # ---- fused MPL_1 message + lin1: per-edge [Dcat] -> [5] --------------
    # bias bm1 is added per edge (before the scatter) so padded edges, whose
    # one-hot column is all-zero, contribute nothing.
    msg5 = (jnp.dot(edge_feat_ref[...], wm1_ref[...],
                    preferred_element_type=f32) + bm1_ref[...])        # [TILE_E, 5] f32

    # ---- scatter-add to destination nodes --------------------------------
    # One-hot built in-kernel in MXU-standard [N, TILE_E] orientation:
    # node index runs over sublanes, edges over lanes.  Padded edges have
    # dst == N (out of range) -> all-zero column.
    node_iota = jax.lax.broadcasted_iota(jnp.int32, (n_nodes, tile_e), 0)
    onehot_nt = (node_iota == dst_ref[...]).astype(bf16)               # [N, TILE_E]
    acc_ref[...] += jnp.dot(onehot_nt, msg5.astype(bf16),
                            preferred_element_type=f32)                # [N, 5]

    @pl.when(e == pl.num_programs(0) - 1)
    def _epilogue():
        # act1(lin1(agg)): w1 already applied per edge, add bias + sigmoid here
        h1 = jax.nn.sigmoid(acc_ref[...] + b1_ref[...])                # [N, 5] f32
        # segment_coo(h1, batch, 'sum') as an in-kernel [G, N] one-hot matmul
        graph_iota = jax.lax.broadcasted_iota(jnp.int32, (n_graphs, n_nodes), 0)
        pool_gn = (graph_iota == batch_ref[...]).astype(f32)           # [G, N]
        pooled = jnp.dot(pool_gn, h1, preferred_element_type=f32)      # [G, 5]
        # act2(lin2(pooled))
        h2 = jax.nn.sigmoid(
            jnp.dot(pooled, w2_ref[...], preferred_element_type=f32) + b2_ref[...])
        # lin3 (lane-padded so the store is 128-lane dense)
        out_ref[...] = (jnp.dot(h2, w3_ref[...], preferred_element_type=f32)
                        + b3_ref[...])


def model6_forward(edge_index, node_attr, edge_attr, batch, params, num_graphs,
                   *, tile_e=256):
    """tile_e: edge-tile width; keep it a multiple of 128 (and of 16 for bf16)."""
    N = node_attr.shape[0]
    E = edge_attr.shape[0]
    G = num_graphs
    f32, bf16, i32 = jnp.float32, jnp.bfloat16, jnp.int32

    src, dst = edge_index[0], edge_index[1]

    # O(E*Din) index gather + concat (no dense gather matmul, no dense one-hots).
    edge_feat = jnp.concatenate(
        [node_attr[src], edge_attr], axis=1).astype(bf16)              # [E, Dcat]
    dcat = edge_feat.shape[1]

    # pad E up to a multiple of tile_e; padded edges get dst = N (out of range)
    # so their in-kernel one-hot column is all-zero and they contribute nothing.
    num_tiles = pl.cdiv(E, tile_e)
    e_pad = num_tiles * tile_e
    dst_row = jnp.full((1, e_pad), N, i32).at[0, :E].set(dst.astype(i32))
    if e_pad != E:
        edge_feat = jnp.pad(edge_feat, ((0, e_pad - E), (0, 0)))
    batch_row = batch.astype(i32).reshape(1, N)

    # Fuse the (linear) MPL_1 message layer with lin1: both are linear and the
    # scatter-add is linear, so (x@wm + bm)@w1 == x@(wm@w1) + bm@w1 per edge.
    wm1 = (params["wm"] @ params["w1"]).astype(bf16)                   # [Dcat, 5]
    bm1 = (params["bm"] @ params["w1"]).astype(f32)                    # [1, 5]

    # lane-pad lin3 so the kernel output store is dense; slice [:, :1] outside.
    w3p = jnp.zeros((D_H2, LANE), f32).at[:, :1].set(params["w3"])
    b3p = jnp.zeros((1, LANE), f32).at[:, :1].set(params["b3"])

    def const(shape):
        return pl.BlockSpec(shape, lambda e: (0, 0))

    grid_spec = pltpu.PrefetchScalarGridSpec(
        num_scalar_prefetch=0,
        grid=(num_tiles,),
        in_specs=[
            pl.BlockSpec((tile_e, dcat), lambda e: (e, 0)),   # edge_feat tile
            pl.BlockSpec((1, tile_e), lambda e: (0, e)),      # dst index tile
            const((1, N)),                                    # batch (resident)
            const((dcat, D_H1)), const((1, D_H1)),            # wm1, bm1
            const((1, D_H1)),                                 # b1
            const((D_H1, D_H2)), const((1, D_H2)),            # w2, b2
            const((D_H2, LANE)), const((1, LANE)),            # w3 (padded), b3 (padded)
        ],
        out_specs=pl.BlockSpec((G, LANE), lambda e: (0, 0)),
        scratch_shapes=[pltpu.VMEM((N, D_H1), f32)],
    )

    flops = (2 * e_pad * (dcat * D_H1 + N * D_H1)
             + 2 * G * N * D_H1 + 2 * G * (D_H1 * D_H2 + D_H2 * LANE))
    bytes_accessed = (2 * e_pad * dcat + 4 * e_pad + 4 * N        # edge feats, dst, batch
                      + 2 * dcat * D_H1                           # wm1 (bf16)
                      + 4 * (2 * D_H1 + D_H1 * D_H2 + D_H2
                             + D_H2 * LANE + LANE)                # f32 biases / weights
                      + 4 * G * LANE)                             # output

    out_padded = pl.pallas_call(
        model6_kernel,
        out_shape=jax.ShapeDtypeStruct((G, LANE), f32),
        grid_spec=grid_spec,
        compiler_params=pltpu.CompilerParams(
            dimension_semantics=("arbitrary",)),   # E axis is a reduction
        cost_estimate=pl.CostEstimate(
            flops=flops,
            transcendentals=N * D_H1 + G * D_H2,
            bytes_accessed=bytes_accessed),
    )(edge_feat, dst_row, batch_row, wm1, bm1,
      params["b1"], params["w2"], params["b2"], w3p, b3p)

    return out_padded[:, :1]


def _init_linear(key, fan_in, fan_out):
    # PyTorch nn.Linear default: U(-1/sqrt(fan_in), 1/sqrt(fan_in))
    kw, kb = jax.random.split(key)
    bound = 1.0 / jnp.sqrt(jnp.float32(fan_in))
    w = jax.random.uniform(kw, (fan_in, fan_out), jnp.float32, -bound, bound)
    b = jax.random.uniform(kb, (1, fan_out), jnp.float32, -bound, bound)
    return w, b


def make_params(key, din, de):
    k0, k1, k2, k3 = jax.random.split(key, 4)
    wm, bm = _init_linear(k0, din + de, D_MSG)   # MPL_1 message linear -> 10
    w1, b1 = _init_linear(k1, D_MSG, D_H1)       # lin1 10 -> 5
    w2, b2 = _init_linear(k2, D_H1, D_H2)        # lin2 5 -> 5
    w3, b3 = _init_linear(k3, D_H2, 1)           # lin3 5 -> 1
    return dict(wm=wm, bm=bm, w1=w1, b1=b1, w2=w2, b2=b2, w3=w3, b3=b3)


def model6_reference(edge_index, node_attr, edge_attr, batch, params, num_graphs):
    # pure-JAX f32 reference of Model6.forward for correctness checking
    src, dst = edge_index[0], edge_index[1]
    msg = (jnp.concatenate([node_attr[src], edge_attr], axis=1) @ params["wm"]
           + params["bm"])
    agg = jax.ops.segment_sum(msg, dst, num_segments=node_attr.shape[0])
    h1 = jax.nn.sigmoid(agg @ params["w1"] + params["b1"])
    pooled = jax.ops.segment_sum(h1, batch, num_segments=num_graphs)
    h2 = jax.nn.sigmoid(pooled @ params["w2"] + params["b2"])
    return h2 @ params["w3"] + params["b3"]


if __name__ == "__main__":
    key = jax.random.PRNGKey(0)
    k_param, k_x, k_ea, k_src, k_dst = jax.random.split(key, 5)

    # small synthetic graph batch, sized so the default tile_e=256 gives
    # 3 edge tiles and exercises the accumulator init / epilogue branches.
    G = 4
    NODES_PER_GRAPH = 16
    EDGES_PER_GRAPH = 150
    N = G * NODES_PER_GRAPH          # 64 nodes
    E = G * EDGES_PER_GRAPH          # 600 edges -> e_pad = 768, 3 grid steps
    DIN, DE = 8, 4

    node_attr = jax.random.normal(k_x, (N, DIN), jnp.float32)
    edge_attr = jax.random.normal(k_ea, (E, DE), jnp.float32)

    # keep edges within their own graph's node range
    srcs, dsts = [], []
    for g in range(G):
        lo, hi = g * NODES_PER_GRAPH, (g + 1) * NODES_PER_GRAPH
        srcs.append(jax.random.randint(jax.random.fold_in(k_src, g),
                                       (EDGES_PER_GRAPH,), lo, hi))
        dsts.append(jax.random.randint(jax.random.fold_in(k_dst, g),
                                       (EDGES_PER_GRAPH,), lo, hi))
    edge_index = jnp.stack([jnp.concatenate(srcs),
                            jnp.concatenate(dsts)], axis=0).astype(jnp.int32)  # [2, E]
    batch = jnp.repeat(jnp.arange(G, dtype=jnp.int32), NODES_PER_GRAPH)        # [N]

    params = make_params(k_param, DIN, DE)

    out = model6_forward(edge_index, node_attr, edge_attr, batch, params, G)
    out = jax.block_until_ready(out)

    ref = model6_reference(edge_index, node_attr, edge_attr, batch, params, G)
    assert out.shape == (G, 1), out.shape
    # bf16 hot-path operands with f32 accumulation vs. all-f32 reference
    assert jnp.allclose(out, ref, atol=2e-2, rtol=2e-2), (out, ref)
    print("KERNEL_OK")
</pallas_src>

<mosaic_0001>
module attributes {stable_mosaic.version = 11 : i64} {
  func.func @model6_kernel(%arg0: i32, %arg1: memref<256x12xbf16, #tpu.memory_space<vmem>>, %arg2: memref<1x256xi32, #tpu.memory_space<vmem>>, %arg3: memref<1x64xi32, #tpu.memory_space<vmem>>, %arg4: memref<12x5xbf16, #tpu.memory_space<vmem>>, %arg5: memref<1x5xf32, #tpu.memory_space<vmem>>, %arg6: memref<1x5xf32, #tpu.memory_space<vmem>>, %arg7: memref<5x5xf32, #tpu.memory_space<vmem>>, %arg8: memref<1x5xf32, #tpu.memory_space<vmem>>, %arg9: memref<5x128xf32, #tpu.memory_space<vmem>>, %arg10: memref<1x128xf32, #tpu.memory_space<vmem>>, %arg11: memref<4x128xf32, #tpu.memory_space<vmem>>, %arg12: memref<64x5xf32, #tpu.memory_space<vmem>>) attributes {dimension_semantics = [#tpu.dimension_semantics<arbitrary>], iteration_bounds = array<i64: 3>, scalar_prefetch = 0 : i64, scratch_operands = 1 : i64, tpu.core_type = #tpu.core_type<tc>, window_params = [{transform_indices = @transform_0, window_bounds = array<i64: 256, 12>}, {transform_indices = @transform_1, window_bounds = array<i64: 1, 256>}, {pipeline_mode = #tpu.pipeline_mode<synchronous>, transform_indices = @transform_2, window_bounds = array<i64: 1, 64>}, {pipeline_mode = #tpu.pipeline_mode<synchronous>, transform_indices = @transform_3, window_bounds = array<i64: 12, 5>}, {pipeline_mode = #tpu.pipeline_mode<synchronous>, transform_indices = @transform_4, window_bounds = array<i64: 1, 5>}, {pipeline_mode = #tpu.pipeline_mode<synchronous>, transform_indices = @transform_5, window_bounds = array<i64: 1, 5>}, {pipeline_mode = #tpu.pipeline_mode<synchronous>, transform_indices = @transform_6, window_bounds = array<i64: 5, 5>}, {pipeline_mode = #tpu.pipeline_mode<synchronous>, transform_indices = @transform_7, window_bounds = array<i64: 1, 5>}, {pipeline_mode = #tpu.pipeline_mode<synchronous>, transform_indices = @transform_8, window_bounds = array<i64: 5, 128>}, {pipeline_mode = #tpu.pipeline_mode<synchronous>, transform_indices = @transform_9, window_bounds = array<i64: 1, 128>}, {pipeline_mode = #tpu.pipeline_mode<synchronous>, transform_indices = @transform_10, window_bounds = array<i64: 4, 128>}]} {
    %c0_i32 = arith.constant 0 : i32
    %0 = arith.cmpi eq, %arg0, %c0_i32 : i32
    %1 = arith.extui %0 : i1 to i32
    %c0_i32_0 = arith.constant 0 : i32
    %2 = arith.cmpi ne, %1, %c0_i32_0 : i32
    scf.if %2 {
      %cst_14 = arith.constant 0.000000e+00 : f32
      %24 = vector.broadcast %cst_14 : f32 to vector<64x5xf32>
      %c0_15 = arith.constant 0 : index
      %c0_16 = arith.constant 0 : index
      %25 = vector.load %arg12[%c0_15, %c0_16] : memref<64x5xf32, #tpu.memory_space<vmem>>, vector<64x5xf32>
      tpu.vector_store %arg12[%c0_15, %c0_16], %24 {strides = array<i32>} : memref<64x5xf32, #tpu.memory_space<vmem>>, vector<64x5xf32>,
    } else {
    }
    %c0 = arith.constant 0 : index
    %c0_1 = arith.constant 0 : index
    %3 = vector.load %arg1[%c0, %c0_1] : memref<256x12xbf16, #tpu.memory_space<vmem>>, vector<256x12xbf16>
    %c0_2 = arith.constant 0 : index
    %c0_3 = arith.constant 0 : index
    %4 = vector.load %arg4[%c0_2, %c0_3] : memref<12x5xbf16, #tpu.memory_space<vmem>>, vector<12x5xbf16>
    %cst = arith.constant dense<0.000000e+00> : vector<256x5xf32>
    %5 = tpu.matmul %3, %4, %cst {dimension_numbers = #tpu.dot_dimension_numbers<[1], [0], [0], [1], [0, 0, 1, 1], [], []>} : vector<256x12xbf16>, vector<12x5xbf16>, vector<256x5xf32> -> vector<256x5xf32>
    %c0_4 = arith.constant 0 : index
    %c0_5 = arith.constant 0 : index
    %6 = vector.load %arg5[%c0_4, %c0_5] : memref<1x5xf32, #tpu.memory_space<vmem>>, vector<1x5xf32>
    %7 = vector.broadcast %6 : vector<1x5xf32> to vector<256x5xf32>
    %8 = arith.addf %5, %7 : vector<256x5xf32>
    %9 = tpu.iota {dimensions = array<i32: 0>} : vector<64x256xi32>
    %c0_6 = arith.constant 0 : index
    %c0_7 = arith.constant 0 : index
    %10 = vector.load %arg2[%c0_6, %c0_7] : memref<1x256xi32, #tpu.memory_space<vmem>>, vector<1x256xi32>
    %11 = vector.broadcast %10 : vector<1x256xi32> to vector<64x256xi32>
    %12 = arith.cmpi eq, %9, %11 : vector<64x256xi32>
    %13 = arith.extui %12 : vector<64x256xi1> to vector<64x256xi32>
    %14 = arith.sitofp %13 : vector<64x256xi32> to vector<64x256xf32>
    %15 = arith.truncf %14 : vector<64x256xf32> to vector<64x256xbf16>
    %c0_8 = arith.constant 0 : index
    %c0_9 = arith.constant 0 : index
    %16 = vector.load %arg12[%c0_8, %c0_9] : memref<64x5xf32, #tpu.memory_space<vmem>>, vector<64x5xf32>
    %17 = arith.truncf %8 : vector<256x5xf32> to vector<256x5xbf16>
    %cst_10 = arith.constant dense<0.000000e+00> : vector<64x5xf32>
    %18 = tpu.matmul %15, %17, %cst_10 {dimension_numbers = #tpu.dot_dimension_numbers<[1], [0], [0], [1], [0, 0, 1, 1], [], []>} : vector<64x256xbf16>, vector<256x5xbf16>, vector<64x5xf32> -> vector<64x5xf32>
    %19 = arith.addf %16, %18 : vector<64x5xf32>
    %c0_11 = arith.constant 0 : index
    %c0_12 = arith.constant 0 : index
    %20 = vector.load %arg12[%c0_11, %c0_12] : memref<64x5xf32, #tpu.memory_space<vmem>>, vector<64x5xf32>
    tpu.vector_store %arg12[%c0_11, %c0_12], %19 {strides = array<i32>} : memref<64x5xf32, #tpu.memory_space<vmem>>, vector<64x5xf32>,
    %c2_i32 = arith.constant 2 : i32
    %21 = arith.cmpi eq, %arg0, %c2_i32 : i32
    %22 = arith.extui %21 : i1 to i32
    %c0_i32_13 = arith.constant 0 : i32
    %23 = arith.cmpi ne, %22, %c0_i32_13 : i32
    scf.if %23 {
      %c0_14 = arith.constant 0 : index
      %c0_15 = arith.constant 0 : index
      %24 = vector.load %arg12[%c0_14, %c0_15] : memref<64x5xf32, #tpu.memory_space<vmem>>, vector<64x5xf32>
      %c0_16 = arith.constant 0 : index
      %c0_17 = arith.constant 0 : index
      %25 = vector.load %arg6[%c0_16, %c0_17] : memref<1x5xf32, #tpu.memory_space<vmem>>, vector<1x5xf32>
      %26 = vector.broadcast %25 : vector<1x5xf32> to vector<64x5xf32>
      %27 = arith.addf %24, %26 : vector<64x5xf32>
      %28 = arith.negf %27 : vector<64x5xf32>
      %29 = math.exp %28 : vector<64x5xf32>
      %cst_18 = arith.constant 1.000000e+00 : f32
      %30 = vector.broadcast %cst_18 : f32 to vector<64x5xf32>
      %31 = arith.addf %30, %29 : vector<64x5xf32>
      %32 = arith.divf %30, %31 : vector<64x5xf32>
      %33 = tpu.iota {dimensions = array<i32: 0>} : vector<4x64xi32>
      %c0_19 = arith.constant 0 : index
      %c0_20 = arith.constant 0 : index
      %34 = vector.load %arg3[%c0_19, %c0_20] : memref<1x64xi32, #tpu.memory_space<vmem>>, vector<1x64xi32>
      %35 = vector.broadcast %34 : vector<1x64xi32> to vector<4x64xi32>
      %36 = arith.cmpi eq, %33, %35 : vector<4x64xi32>
      %37 = arith.extui %36 : vector<4x64xi1> to vector<4x64xi32>
      %38 = arith.sitofp %37 : vector<4x64xi32> to vector<4x64xf32>
      %cst_21 = arith.constant dense<0.000000e+00> : vector<4x5xf32>
      %39 = tpu.matmul %38, %32, %cst_21 {dimension_numbers = #tpu.dot_dimension_numbers<[1], [0], [0], [1], [0, 0, 1, 1], [], []>} : vector<4x64xf32>, vector<64x5xf32>, vector<4x5xf32> -> vector<4x5xf32>
      %c0_22 = arith.constant 0 : index
      %c0_23 = arith.constant 0 : index
      %40 = vector.load %arg7[%c0_22, %c0_23] : memref<5x5xf32, #tpu.memory_space<vmem>>, vector<5x5xf32>
      %cst_24 = arith.constant dense<0.000000e+00> : vector<4x5xf32>
      %41 = tpu.matmul %39, %40, %cst_24 {dimension_numbers = #tpu.dot_dimension_numbers<[1], [0], [0], [1], [0, 0, 1, 1], [], []>} : vector<4x5xf32>, vector<5x5xf32>, vector<4x5xf32> -> vector<4x5xf32>
      %c0_25 = arith.constant 0 : index
      %c0_26 = arith.constant 0 : index
      %42 = vector.load %arg8[%c0_25, %c0_26] : memref<1x5xf32, #tpu.memory_space<vmem>>, vector<1x5xf32>
      %43 = vector.broadcast %42 : vector<1x5xf32> to vector<4x5xf32>
      %44 = arith.addf %41, %43 : vector<4x5xf32>
      %45 = arith.negf %44 : vector<4x5xf32>
      %46 = math.exp %45 : vector<4x5xf32>
      %cst_27 = arith.constant 1.000000e+00 : f32
      %47 = vector.broadcast %cst_27 : f32 to vector<4x5xf32>
      %48 = arith.addf %47, %46 : vector<4x5xf32>
      %49 = arith.divf %47, %48 : vector<4x5xf32>
      %c0_28 = arith.constant 0 : index
      %c0_29 = arith.constant 0 : index
      %50 = vector.load %arg9[%c0_28, %c0_29] : memref<5x128xf32, #tpu.memory_space<vmem>>, vector<5x128xf32>
      %cst_30 = arith.constant dense<0.000000e+00> : vector<4x128xf32>
      %51 = tpu.matmul %49, %50, %cst_30 {dimension_numbers = #tpu.dot_dimension_numbers<[1], [0], [0], [1], [0, 0, 1, 1], [], []>} : vector<4x5xf32>, vector<5x128xf32>, vector<4x128xf32> -> vector<4x128xf32>
      %c0_31 = arith.constant 0 : index
      %c0_32 = arith.constant 0 : index
      %52 = vector.load %arg10[%c0_31, %c0_32] : memref<1x128xf32, #tpu.memory_space<vmem>>, vector<1x128xf32>
      %53 = vector.broadcast %52 : vector<1x128xf32> to vector<4x128xf32>
      %54 = arith.addf %51, %53 : vector<4x128xf32>
      %c0_33 = arith.constant 0 : index
      %c0_34 = arith.constant 0 : index
      %55 = vector.load %arg11[%c0_33, %c0_34] : memref<4x128xf32, #tpu.memory_space<vmem>>, vector<4x128xf32>
      tpu.vector_store %arg11[%c0_33, %c0_34], %54 {strides = array<i32>} : memref<4x128xf32, #tpu.memory_space<vmem>>, vector<4x128xf32>,
    } else {
    }
    return
  }
  func.func @transform_0(%arg0: i32) -> (i32, i32) {
    %c0_i32 = arith.constant 0 : i32
    %c0_i32_0 = arith.constant 0 : i32
    return %arg0, %c0_i32 : i32, i32
  }
  func.func @transform_1(%arg0: i32) -> (i32, i32) {
    %c0_i32 = arith.constant 0 : i32
    %c0_i32_0 = arith.constant 0 : i32
    return %c0_i32, %arg0 : i32, i32
  }
  func.func @transform_2(%arg0: i32) -> (i32, i32) {
    %c0_i32 = arith.constant 0 : i32
    %c0_i32_0 = arith.constant 0 : i32
    %c0_i32_1 = arith.constant 0 : i32
    return %c0_i32, %c0_i32_0 : i32, i32
  }
  func.func @transform_3(%arg0: i32) -> (i32, i32) {
    %c0_i32 = arith.constant 0 : i32
    %c0_i32_0 = arith.constant 0 : i32
    %c0_i32_1 = arith.constant 0 : i32
    return %c0_i32, %c0_i32_0 : i32, i32
  }
  func.func @transform_4(%arg0: i32) -> (i32, i32) {
    %c0_i32 = arith.constant 0 : i32
    %c0_i32_0 = arith.constant 0 : i32
    %c0_i32_1 = arith.constant 0 : i32
    return %c0_i32, %c0_i32_0 : i32, i32
  }
  func.func @transform_5(%arg0: i32) -> (i32, i32) {
    %c0_i32 = arith.constant 0 : i32
    %c0_i32_0 = arith.constant 0 : i32
    %c0_i32_1 = arith.constant 0 : i32
    return %c0_i32, %c0_i32_0 : i32, i32
  }
  func.func @transform_6(%arg0: i32) -> (i32, i32) {
    %c0_i32 = arith.constant 0 : i32
    %c0_i32_0 = arith.constant 0 : i32
    %c0_i32_1 = arith.constant 0 : i32
    return %c0_i32, %c0_i32_0 : i32, i32
  }
  func.func @transform_7(%arg0: i32) -> (i32, i32) {
    %c0_i32 = arith.constant 0 : i32
    %c0_i32_0 = arith.constant 0 : i32
    %c0_i32_1 = arith.constant 0 : i32
    return %c0_i32, %c0_i32_0 : i32, i32
  }
  func.func @transform_8(%arg0: i32) -> (i32, i32) {
    %c0_i32 = arith.constant 0 : i32
    %c0_i32_0 = arith.constant 0 : i32
    %c0_i32_1 = arith.constant 0 : i32
    return %c0_i32, %c0_i32_0 : i32, i32
  }
  func.func @transform_9(%arg0: i32) -> (i32, i32) {
    %c0_i32 = arith.constant 0 : i32
    %c0_i32_0 = arith.constant 0 : i32
    %c0_i32_1 = arith.constant 0 : i32
    return %c0_i32, %c0_i32_0 : i32, i32
  }
  func.func @transform_10(%arg0: i32) -> (i32, i32) {
    %c0_i32 = arith.constant 0 : i32
    %c0_i32_0 = arith.constant 0 : i32
    %c0_i32_1 = arith.constant 0 : i32
    return %c0_i32, %c0_i32_0 : i32, i32
  }
}

</mosaic_0001>

<bundles_post_ra>
// kernel: tpu_custom_call.1
= control target key start
LH: loop header
LB: loop body
LE: loop exit
PB: predicated region body
PF: predicated region fallthrough
CT: control target
= control target key end

     0   :  { %15 = vsyncpa [#allocation4], 0  ;;  %s1689_s13 = smov 0   ;;  %s1951_s0 = inlined_call_operand.vmem [shape: bf16[768,12], index: 0, kind: input, shape index: {}]   ;;  %s1952_s1 = inlined_call_operand.vmem [shape: s32[1,768], index: 1, kind: input, shape index: {}]   ;;  %s1953_s2 = inlined_call_operand.vmem [shape: s32[1,64], index: 2, kind: input, shape index: {}]   ;;  %s1954_s3 = inlined_call_operand.vmem [shape: bf16[12,5], index: 3, kind: input, shape index: {}]   ;;  %s1955_s4 = inlined_call_operand.vmem [shape: f32[1,5], index: 4, kind: input, shape index: {}]   ;;  %s1956_s5 = inlined_call_operand.vmem [shape: f32[1,5], index: 5, kind: input, shape index: {}]   ;;  %s1957_s6 = inlined_call_operand.vmem [shape: f32[5,5], index: 6, kind: input, shape index: {}]   ;;  %s1958_s7 = inlined_call_operand.vmem [shape: f32[1,5], index: 7, kind: input, shape index: {}]   ;;  %s1959_s8 = inlined_call_operand.vmem [shape: f32[5,128], index: 8, kind: input, shape index: {}]   ;;  %s1960_s9 = inlined_call_operand.vmem [shape: f32[1,128], index: 9, kind: input, shape index: {}]   ;;  %s1961_s10 = inlined_call_operand.hbm [shape: f32[4,128], index: 10, kind: output, shape index: {}]  }
   0x1 LB: > { %s1695_s14 = sadd.s32 4294967295, %s1627_s13   ;;  %p1292_p0 = scmp.ge.s32.totalorder %s1627_s13, 1  ;;  %s1627_s13 = sphi %s1689_s13, %s21_s13  }
   0x2   : > { %p319_p1 = scmp.lt.s32.totalorder %s1627_s13, 4 }
   0x4   : > { %p320_p2 = pnand %p1292_p0, %p319_p1 }
   0x5   : > { %s1293_s15 = sshll.u32 (!%p320_p2), %s1695_s14, 5  ;;  %s1295_s16 = sshll.u32 (!%p320_p2), %s1695_s14, 1 }
   0x6   : > { %323 = sbr.rel (%p320_p2) target bundleno = 1232 (0x4d0), region = 60  ;;  %p357_p3 = scmp.lt.s32.totalorder (!%p320_p2), %s1293_s15, 95 }
   0x7   : > { %p363_p4 = scmp.lt.s32.totalorder (!%p320_p2), %s1295_s16, 5  ;;  %p1296_p5 = scmp.ne.s32.totalorder (!%p320_p2), %s1695_s14, 0 }
   0xb   : > { %s1977_s15 = smov (!%p357_p3, %s1293_s15), 95  ;;  %s1979_s16 = smov (!%p363_p4, %s1295_s16), 5 }
   0xc   : > { %s1294_s17 = sshll.u32 %s1977_s15, 2  ;;  %s365_s23 = scalar_lea.vmem %s1952_s1, %s1979_s16 }
   0xd   : > { %s1706_s20 = scalar_lea.vmem %s1951_s0, %s1294_s17  ;;  %371 = sbr.rel (%p1296_p5) target bundleno = 23 (0x17), region = 64 }
  0x12   : > { %vm372_vm0 = vcmask 39936   ;;  %v1629_v0 = vmov 0.0  }
  0x13   : > { %373 = vst.msk [vmem:[#allocation2] sm:$0xff] %vm372_vm0, %v1629_v0  ;;  %374 = vst.msk [vmem:[#allocation2 + $0x8] sm:$0xff] %vm372_vm0, %v1629_v0 }
  0x14   : > { %375 = vst.msk [vmem:[#allocation2 + $0x10] sm:$0xff] %vm372_vm0, %v1629_v0  ;;  %376 = vst.msk [vmem:[#allocation2 + $0x18] sm:$0xff] %vm372_vm0, %v1629_v0 }
  0x15   : > { %377 = vst.msk [vmem:[#allocation2 + $0x20] sm:$0xff] %vm372_vm0, %v1629_v0  ;;  %378 = vst.msk [vmem:[#allocation2 + $0x28] sm:$0xff] %vm372_vm0, %v1629_v0 }
  0x16   : > { %379 = vst.msk [vmem:[#allocation2 + $0x30] sm:$0xff] %vm372_vm0, %v1629_v0  ;;  %380 = vst.msk [vmem:[#allocation2 + $0x38] sm:$0xff] %vm372_vm0, %v1629_v0 }
  0x17 PF: > { %v1540_v1 = vld [vmem:[%s1954_s3] sm:$0x3f]   ;;  %vm556_vm1 = vcmask 1045504   ;;  %vm507_vm2 = vcmask 97280   ;;  %v1542_v4 = vld [vmem:[%s1706_s20 + $0x8] sm:$0xff]   ;;  %v1543_v5 = vld [vmem:[%s1706_s20 + $0x10] sm:$0xff]   ;;  %v721_v19 = vlaneseq }
  0x18   : > { %v1541_v2 = vld [vmem:[%s1706_s20] sm:$0xff]   ;;  %1520 = vmatprep.subr.msk.bf16.mxu0 %vm556_vm1, %v1540_v1  ;;  %v558_v3 = vsel %vm556_vm1, %v1540_v1, 0  ;;  %v1544_v6 = vld [vmem:[%s1706_s20 + $0x18] sm:$0xff]   ;;  %v1546_v8 = vld [vmem:[%s1706_s20 + $0x28] sm:$0xff]   ;;  %v1630_v27 = vmov 1.0|1.0  }
  0x19   : > { %1458 = vmatpush3.bf16.msra.mxu0 %v558_v3  ;;  %1459 = vmatprep.mubr.msk.bf16.mxu0 %vm507_vm2, %v1541_v2  ;;  %v1545_v7 = vld [vmem:[%s1706_s20 + $0x20] sm:$0xff]   ;;  %v1547_v9 = vld [vmem:[%s1706_s20 + $0x30] sm:$0xff]   ;;  %v1548_v10 = vld [vmem:[%s1706_s20 + $0x38] sm:$0xff]   ;;  %v1748_v20 = vshrl.u32 %v721_v19, 7  ;;  %p1363_p6 = scmp.ne.s32.totalorder %s1695_s14, 2 }
  0x1a   : > { %v1549_v11 = vld [vmem:[%s1706_s20 + $0x40] sm:$0xff]   ;;  %v1550_v12 = vld [vmem:[%s1706_s20 + $0x48] sm:$0xff]   ;;  %v1551_v13 = vld [vmem:[%s1706_s20 + $0x50] sm:$0xff]  }
  0x1b   : > { %v1552_v14 = vld [vmem:[%s1706_s20 + $0x58] sm:$0xff]   ;;  %v1553_v15 = vld [vmem:[%s1706_s20 + $0x60] sm:$0xff]   ;;  %v1554_v16 = vld [vmem:[%s1706_s20 + $0x68] sm:$0xff]   ;;  %v737_v21 = vsub.s32 1, %v1748_v20  ;;  %v733_v23 = vsub.s32 0, %v1748_v20  ;;  %v723_v24 = vadd.s32 8, %v1748_v20 }
  0x1c   : > { %1460 = vmatmul.mubr.msk.bf16.vlgmr.msra.gmra.mxu0 %vm507_vm2, %v1542_v4  ;;  %v1555_v17 = vld [vmem:[%s1706_s20 + $0x70] sm:$0xff]   ;;  %v1556_v18 = vld [vmem:[%s1706_s20 + $0x78] sm:$0xff]   ;;  %v730_v22 = vld [vmem:[%s365_s23] sm:$0x3]  ;;  %v724_v29 = vadd.s32 16, %v1748_v20  ;;  %v725_v30 = vadd.s32 24, %v1748_v20 }
  0x1d   : > { %1463 = vmatprep.mubr.msk.bf16.mxu0 %vm507_vm2, %v1543_v5  ;;  %v738_v25 = vrot.slane %v730_v22, %v737_v21  ;;  %v734_v26 = vrot.slane %v730_v22, %v733_v23  ;;  %v726_v33 = vadd.s32 32, %v1748_v20  ;;  %v727_v34 = vadd.s32 40, %v1748_v20  ;;  %v1798_v42 = vld [vmem:[%s1955_s4] ss:$0 sm:$0xff]  ;;  %v797_v39 = vld [vmem:[#allocation2 + $0x10] sm:$0xff] }
  0x1e   : > { %v728_v37 = vadd.s32 48, %v1748_v20  ;;  %v729_v38 = vadd.s32 56, %v1748_v20  ;;  %v795_v31 = vld [vmem:[#allocation2] sm:$0xff] }
  0x1f   : > { %vm740_vm3 = vcmp.eq.s32.totalorder %v1748_v20, %v738_v25  ;;  %vm742_vm4 = vcmp.eq.s32.totalorder %v723_v24, %v738_v25  ;;  %vm739_vm6 = vcmp.eq.s32.totalorder %v1748_v20, %v734_v26  ;;  %vm741_vm7 = vcmp.eq.s32.totalorder %v723_v24, %v734_v26 }
  0x20   : > { %vm1347_vm5 = vmpackc.low %vm742_vm4, %vm740_vm3  ;;  %vm744_vm9 = vcmp.eq.s32.totalorder %v724_v29, %v738_v25  ;;  %vm746_vm10 = vcmp.eq.s32.totalorder %v725_v30, %v738_v25  ;;  %vm743_vm11 = vcmp.eq.s32.totalorder %v724_v29, %v734_v26  ;;  %vm745_vm12 = vcmp.eq.s32.totalorder %v725_v30, %v734_v26 }
  0x21   : > { %1348 = vmatprep.mubr.msk.bf16.mxu1 %vm1347_vm5, %v1630_v27  ;;  %vm1761_vm8 = vmpackc.low %vm741_vm7, %vm739_vm6  ;;  %vm748_vm15 = vcmp.eq.s32.totalorder %v726_v33, %v738_v25  ;;  %vm750_vm0 = vcmp.eq.s32.totalorder %v727_v34, %v738_v25  ;;  %vm747_vm1 = vcmp.eq.s32.totalorder %v726_v33, %v734_v26  ;;  %vm752_vm5 = vcmp.eq.s32.totalorder %v728_v37, %v738_v25 }
  0x22   : > { %vm1767_vm13 = vmpackc.low %vm746_vm10, %vm744_vm9  ;;  %vm754_vm6 = vcmp.eq.s32.totalorder %v729_v38, %v738_v25  ;;  %vm751_vm7 = vcmp.eq.s32.totalorder %v728_v37, %v734_v26  ;;  %vm753_vm9 = vcmp.eq.s32.totalorder %v729_v38, %v734_v26 }
  0x23   : > { %vm1771_vm14 = vmpackc.low %vm745_vm12, %vm743_vm11 }
  0x24   : > { %1464 = vmatmul.mubr.msk.bf16.gmra.mxu0 %vm507_vm2, %v1544_v6  ;;  %vm1777_vm3 = vmpackc.low %vm750_vm0, %vm748_vm15 }
  0x25   : > { %1467 = vmatprep.mubr.msk.bf16.mxu0 %vm507_vm2, %v1545_v7  ;;  %vm1787_vm10 = vmpackc.low %vm754_vm6, %vm752_vm5 }
  0x26   : > { %vm1791_vm11 = vmpackc.low %vm753_vm9, %vm751_vm7 }
  0x2c   : > { %1468 = vmatmul.mubr.msk.bf16.gmra.mxu0 %vm507_vm2, %v1546_v8 }
  0x2d   : > { %1471 = vmatprep.mubr.msk.bf16.mxu0 %vm507_vm2, %v1547_v9 }
  0x34   : > { %1472 = vmatmul.mubr.msk.bf16.gmra.mxu0 %vm507_vm2, %v1548_v10 }
  0x35   : > { %1475 = vmatprep.mubr.msk.bf16.mxu0 %vm507_vm2, %v1549_v11 }
  0x3c   : > { %1476 = vmatmul.mubr.msk.bf16.gmra.mxu0 %vm507_vm2, %v1550_v12 }
  0x3d   : > { %1479 = vmatprep.mubr.msk.bf16.mxu0 %vm507_vm2, %v1551_v13 }
  0x44   : > { %1480 = vmatmul.mubr.msk.bf16.gmra.mxu0 %vm507_vm2, %v1552_v14 }
  0x45   : > { %1483 = vmatprep.mubr.msk.bf16.mxu0 %vm507_vm2, %v1553_v15 }
  0x4c   : > { %1484 = vmatmul.mubr.msk.bf16.gmra.mxu0 %vm507_vm2, %v1554_v16 }
  0x4d   : > { %1487 = vmatprep.mubr.msk.bf16.mxu0 %vm507_vm2, %v1555_v17 }
  0x54   : > { %1488 = vmatmul.mubr.msk.bf16.gmra.mxu0 %vm507_vm2, %v1556_v18  ;;  %vm749_vm2 = vcmp.eq.s32.totalorder %v727_v34, %v734_v26 }
  0x55   : > { %vm1781_vm4 = vmpackc.low %vm749_vm2, %vm747_vm1 }
  0xdc   : > { %v1461_v41 = vpop.f32.mrf.mxu0 }
  0xdd   : > { %v1801_v45 = vadd.f32 %v1461_v41, %v1798_v42 }
  0xde   : > { %v594_v43 = vpop.f32.mrf.mxu0 }
  0xdf   : > { %v1807_v48 = vadd.f32 %v1798_v42, %v594_v43 }
  0xe0   : > { %v1462_v44 = vpop.f32.mrf.mxu0 }
  0xe1   : > { %v1804_v46 = vadd.f32 %v1462_v44, %v1798_v42 }
  0xe2   : > { %v597_v47 = vpop.f32.mrf.mxu0 }
  0xe3   : > { %v804_v49 = vpack.c.bf16 %v1804_v46, %v1801_v45  ;;  %v1812_v50 = vadd.f32 %v1798_v42, %v597_v47  ;;  %v796_v46 = vld [vmem:[#allocation2 + $0x8] sm:$0xff] }
  0xe4   : > { %v1465_v51 = vpop.f32.mrf.mxu0 }
  0xe5   : > { %v803_v52 = vpack.c.bf16 %v1812_v50, %v1807_v48  ;;  %v1817_v55 = vadd.f32 %v1465_v51, %v1798_v42 }
  0xe6   : > { %v610_v53 = vpop.f32.mrf.mxu0 }
  0xe7   : > { %v1823_v58 = vadd.f32 %v1798_v42, %v610_v53 }
  0xe8   : > { %v1466_v54 = vpop.f32.mrf.mxu0 }
  0xe9   : > { %v1820_v56 = vadd.f32 %v1466_v54, %v1798_v42 }
  0xea   : > { %v613_v57 = vpop.f32.mrf.mxu0 }
  0xeb   : > { %v806_v59 = vpack.c.bf16 %v1820_v56, %v1817_v55  ;;  %v1828_v60 = vadd.f32 %v1798_v42, %v613_v57  ;;  %v798_v56 = vld [vmem:[#allocation2 + $0x18] sm:$0xff] }
  0xec   : > { %v1469_v61 = vpop.f32.mrf.mxu0 }
  0xed   : > { %v805_v62 = vpack.c.bf16 %v1828_v60, %v1823_v58  ;;  %v635_v57 = vadd.f32 %v1469_v61, %v1798_v42 }
  0xee   : > { %v626_v63 = vpop.f32.mrf.mxu0 }
  0xf0   : > { %v1470_v0 = vpop.f32.mrf.mxu0 }
  0xf1   : > { %v638_v47 = vadd.f32 %v1470_v0, %v1798_v42 }
  0xf2   : > { %v629_v1 = vpop.f32.mrf.mxu0 }
  0xf4   : > { %v1473_v2 = vpop.f32.mrf.mxu0 }
  0xf5   : > { %v651_v25 = vadd.f32 %v1473_v2, %v1798_v42 }
  0xf6   : > { %v642_v3 = vpop.f32.mrf.mxu0 }
  0xf7   : > { %v643_v43 = vadd.f32 %v1798_v42, %v642_v3 }
  0xf8   : > { %v1474_v4 = vpop.f32.mrf.mxu0 }
  0xf9   : > { %v654_v21 = vadd.f32 %v1474_v4, %v1798_v42  ;;  %v808_v4 = vpack.c.bf16 %v638_v47, %v635_v57 }
  0xfa   : > { %v645_v5 = vpop.f32.mrf.mxu0 }
  0xfb   : > { %v646_v34 = vadd.f32 %v1798_v42, %v645_v5  ;;  %v810_v37 = vpack.c.bf16 %v654_v21, %v651_v25  ;;  %v630_v5 = vadd.f32 %v1798_v42, %v629_v1 }
  0xfc   : > { %v1477_v6 = vpop.f32.mrf.mxu0 }
  0xfd   : > { %v809_v51 = vpack.c.bf16 %v646_v34, %v643_v43 }
  0xfe   : > { %v658_v7 = vpop.f32.mrf.mxu0 }
 0x100   : > { %v1478_v8 = vpop.f32.mrf.mxu0 }
 0x102   : > { %v661_v9 = vpop.f32.mrf.mxu0 }
 0x104   : > { %v1481_v10 = vpop.f32.mrf.mxu0 }
 0x105   : > { %v683_v0 = vadd.f32 %v1481_v10, %v1798_v42 }
 0x106   : > { %v674_v11 = vpop.f32.mrf.mxu0 }
 0x108   : > { %v1482_v12 = vpop.f32.mrf.mxu0 }
 0x109   : > { %v686_v3 = vadd.f32 %v1482_v12, %v1798_v42  ;;  %v662_v12 = vadd.f32 %v1798_v42, %v661_v9 }
 0x10a   : > { %v677_v13 = vpop.f32.mrf.mxu0 }
 0x10b   : > { %v678_v61 = vadd.f32 %v1798_v42, %v677_v13 }
 0x10c   : > { %v1485_v14 = vpop.f32.mrf.mxu0 }
 0x10d   : > { %v699_v44 = vadd.f32 %v1485_v14, %v1798_v42  ;;  %v627_v14 = vadd.f32 %v1798_v42, %v626_v63  ;;  %v667_v63 = vadd.f32 %v1477_v6, %v1798_v42  ;;  %v799_v6 = vld [vmem:[#allocation2 + $0x20] sm:$0xff] }
 0x10e   : > { %v690_v15 = vpop.f32.mrf.mxu0 }
 0x10f   : > { %v691_v2 = vadd.f32 %v1798_v42, %v690_v15  ;;  %v675_v15 = vadd.f32 %v1798_v42, %v674_v11  ;;  %v659_v11 = vadd.f32 %v1798_v42, %v658_v7 }
 0x110   : > { %v1486_v16 = vpop.f32.mrf.mxu0 }
 0x111   : > { %v702_v38 = vadd.f32 %v1486_v16, %v1798_v42  ;;  %v813_v1 = vpack.c.bf16 %v678_v61, %v675_v15  ;;  %v811_v13 = vpack.c.bf16 %v662_v12, %v659_v11 }
 0x112   : > { %v693_v17 = vpop.f32.mrf.mxu0 }
 0x113   : > { %v816_v53 = vpack.c.bf16 %v702_v38, %v699_v44  ;;  %v694_v54 = vadd.f32 %v1798_v42, %v693_v17  ;;  %v814_v17 = vpack.c.bf16 %v686_v3, %v683_v0  ;;  %v802_v38 = vld [vmem:[#allocation2 + $0x38] sm:$0xff] }
 0x114   : > { %v1489_v18 = vpop.f32.mrf.mxu0 }
 0x115   : > { %v715_v23 = vadd.f32 %v1489_v18, %v1798_v42  ;;  %v815_v16 = vpack.c.bf16 %v694_v54, %v691_v2  ;;  %v807_v18 = vpack.c.bf16 %v630_v5, %v627_v14 }
 0x116   : > { %v706_v19 = vpop.f32.mrf.mxu0 }
 0x117   : > { %v707_v29 = vadd.f32 %v1798_v42, %v706_v19  ;;  %v670_v19 = vadd.f32 %v1478_v8, %v1798_v42 }
 0x118   : > { %v1490_v22 = vpop.f32.mrf.mxu0 }
 0x119   : > { %v718_v24 = vadd.f32 %v1490_v22, %v1798_v42  ;;  %v812_v10 = vpack.c.bf16 %v670_v19, %v667_v63  ;;  %v800_v22 = vld [vmem:[#allocation2 + $0x28] sm:$0xff] }
 0x11a   : > { %v709_v26 = vpop.f32.mrf.mxu0 }
 0x11b   : > { %v710_v30 = vadd.f32 %v1798_v42, %v709_v26  ;;  %v818_v33 = vpack.c.bf16 %v718_v24, %v715_v23 }
 0x11d   : > { %v817_v41 = vpack.c.bf16 %v710_v30, %v707_v29  ;;  %1404 = vmatprep.subr.bf16.mxu1 %v818_v33  ;;  %v801_v29 = vld [vmem:[#allocation2 + $0x30] sm:$0xff] }
 0x11e   : > { %1405 = vmatpush3.bf16.msra.mxu1 %v810_v37 }
 0x11f   : > { %1406 = vmatprep.subr.bf16.mxu1 %v817_v41 }
 0x122   : > { %1407 = vmatpush3.bf16.msra.mxu1 %v809_v51 }
 0x123   : > { %1408 = vmatprep.subr.bf16.mxu1 %v816_v53 }
 0x126   : > { %1409 = vmatpush3.bf16.msra.mxu1 %v808_v4 }
 0x127   : > { %1410 = vmatprep.subr.bf16.mxu1 %v815_v16 }
 0x12a   : > { %1411 = vmatpush3.bf16.msra.mxu1 %v807_v18 }
 0x12b   : > { %1412 = vmatprep.subr.bf16.mxu1 %v814_v17 }
 0x12e   : > { %1413 = vmatpush3.bf16.msra.mxu1 %v806_v59 }
 0x12f   : > { %1414 = vmatprep.subr.bf16.mxu1 %v813_v1 }
 0x132   : > { %1415 = vmatpush3.bf16.msra.mxu1 %v805_v62 }
 0x133   : > { %1416 = vmatprep.subr.bf16.mxu1 %v812_v10 }
 0x136   : > { %1417 = vmatpush3.bf16.msra.mxu1 %v804_v49 }
 0x137   : > { %1418 = vmatprep.subr.bf16.mxu1 %v811_v13 }
 0x13a   : > { %1419 = vmatpush3.bf16.msra.mxu1 %v803_v52 }
 0x13d   : > { %1350 = vmatmul.mubr.msk.bf16.vlgmr.msra.gmra.mxu1 %vm1761_vm8, %v1630_v27  ;;  %vm892_vm8 = vcmask 39936  }
 0x13e   : > { %1352 = vmatprep.mubr.msk.bf16.mxu1 %vm1767_vm13, %v1630_v27 }
 0x145   : > { %1354 = vmatmul.mubr.msk.bf16.gmra.mxu1 %vm1771_vm14, %v1630_v27 }
 0x146   : > { %1356 = vmatprep.mubr.msk.bf16.mxu1 %vm1777_vm3, %v1630_v27 }
 0x14d   : > { %1358 = vmatmul.mubr.msk.bf16.gmra.mxu1 %vm1781_vm4, %v1630_v27 }
 0x14e   : > { %1360 = vmatprep.mubr.msk.bf16.mxu1 %vm1787_vm10, %v1630_v27 }
 0x155   : > { %1362 = vmatmul.mubr.msk.bf16.gmra.mxu1 %vm1791_vm11, %v1630_v27 }
 0x1fd   : > { %v1420_v28 = vpop.f32.mrf.mxu1 }
 0x1ff   : > { %v1421_v32 = vpop.f32.mrf.mxu1 }
 0x200   : > { %v1422_v42 = vadd.f32 %v1421_v32, %v1420_v28 }
 0x201   : > { %v1423_v45 = vpop.f32.mrf.mxu1 }
 0x202   : > { %v884_v35 = vadd.f32 %v1422_v42, %v795_v31 }
 0x203   : > { %v1424_v48 = vpop.f32.mrf.mxu1 }
 0x204   : > { %893 = vst.msk [vmem:[#allocation2] sm:$0xff] %vm892_vm8, %v884_v35  ;;  %v1425_v36 = vadd.f32 %v1424_v48, %v1423_v45 }
 0x205   : > { %v1426_v49 = vpop.f32.mrf.mxu1 }
 0x206   : > { %v885_v50 = vadd.f32 %v1425_v36, %v796_v46 }
 0x207   : > { %v1427_v52 = vpop.f32.mrf.mxu1 }
 0x208   : > { %894 = vst.msk [vmem:[#allocation2 + $0x8] sm:$0xff] %vm892_vm8, %v885_v50  ;;  %v1428_v40 = vadd.f32 %v1427_v52, %v1426_v49 }
 0x209   : > { %v1429_v27 = vpop.f32.mrf.mxu1 }
 0x20a   : > { %v886_v55 = vadd.f32 %v1428_v40, %v797_v39 }
 0x20b   : > { %v1430_v58 = vpop.f32.mrf.mxu1 }
 0x20c   : > { %895 = vst.msk [vmem:[#allocation2 + $0x10] sm:$0xff] %vm892_vm8, %v886_v55  ;;  %v1431_v59 = vadd.f32 %v1430_v58, %v1429_v27 }
 0x20d   : > { %v1432_v60 = vpop.f32.mrf.mxu1 }
 0x20e   : > { %v887_v62 = vadd.f32 %v1431_v59, %v798_v56 }
 0x20f   : > { %v1433_v7 = vpop.f32.mrf.mxu1 }
 0x210   : > { %896 = vst.msk [vmem:[#allocation2 + $0x18] sm:$0xff] %vm892_vm8, %v887_v62  ;;  %v1434_v8 = vadd.f32 %v1433_v7, %v1432_v60 }
 0x211   : > { %v1435_v9 = vpop.f32.mrf.mxu1 }
 0x212   : > { %v888_v21 = vadd.f32 %v1434_v8, %v799_v6 }
 0x213   : > { %v1436_v23 = vpop.f32.mrf.mxu1 }
 0x214   : > { %897 = vst.msk [vmem:[#allocation2 + $0x20] sm:$0xff] %vm892_vm8, %v888_v21  ;;  %v1437_v24 = vadd.f32 %v1436_v23, %v1435_v9 }
 0x215   : > { %v1438_v25 = vpop.f32.mrf.mxu1 }
 0x216   : > { %v889_v26 = vadd.f32 %v1437_v24, %v800_v22 }
 0x217   : > { %v1439_v30 = vpop.f32.mrf.mxu1 }
 0x218   : > { %898 = vst.msk [vmem:[#allocation2 + $0x28] sm:$0xff] %vm892_vm8, %v889_v26  ;;  %v1440_v33 = vadd.f32 %v1439_v30, %v1438_v25 }
 0x219   : > { %v1441_v34 = vpop.f32.mrf.mxu1 }
 0x21a   : > { %v890_v37 = vadd.f32 %v1440_v33, %v801_v29 }
 0x21b   : > { %v1442_v41 = vpop.f32.mrf.mxu1 }
 0x21c   : > { %899 = vst.msk [vmem:[#allocation2 + $0x30] sm:$0xff] %vm892_vm8, %v890_v37  ;;  %v1443_v43 = vadd.f32 %v1442_v41, %v1441_v34  ;;  %904 = sbr.rel (%p1363_p6) target bundleno = 1217 (0x4c1), region = 68 }
 0x21e   : > { %v891_v44 = vadd.f32 %v1443_v43, %v802_v38 }
 0x220   : > { %900 = vst.msk [vmem:[#allocation2 + $0x38] sm:$0xff] %vm892_vm8, %v891_v44 }
 0x221   : > { %v1364_v51 = vld [vmem:[%s1956_s5] ss:$0 sm:$0xff]  ;;  %v1631_v54 = vmov 0.0   ;;  %v910_v4 = vld [vmem:[#allocation2 + $0x28] sm:$0xff]  ;;  %v908_v3 = vld [vmem:[#allocation2 + $0x18] sm:$0xff]  ;;  %vm1632_vm12 = vmmov 0  }
 0x222   : > { %1491 = vmatprep.subr.mxu0 %v1631_v54  ;;  %v909_v5 = vld [vmem:[#allocation2 + $0x20] sm:$0xff]  ;;  %1507 = vmatprep.mubr.msk.f32.mxu0 %vm1632_vm12, %v1631_v54  ;;  %v925_v16 = vadd.f32 %v1364_v51, %v910_v4  ;;  %v923_v0 = vadd.f32 %v1364_v51, %v908_v3  ;;  %v907_v18 = vld [vmem:[#allocation2 + $0x10] sm:$0xff]  ;;  %v906_v17 = vld [vmem:[#allocation2 + $0x8] sm:$0xff]  ;;  %vm984_vm14 = vcmask 523264   ;;  %vm1069_vm15 = vcmask 1044480  }
 0x223   : > { %v911_v53 = vld [vmem:[#allocation2 + $0x30] sm:$0xff]  ;;  %v924_v14 = vadd.f32 %v1364_v51, %v909_v5  ;;  %v905_v61 = vld [vmem:[#allocation2] sm:$0xff]  ;;  %1510 = vmatprep.subr.mxu1 %v1631_v54  ;;  %1512 = vmatprep.mubr.msk.f32.mxu1 %vm1632_vm12, %v1631_v54  ;;  %v922_v1 = vadd.f32 %v1364_v51, %v907_v18  ;;  %v921_v63 = vadd.f32 %v1364_v51, %v906_v17 }
 0x224   : > { %v926_v2 = vadd.f32 %v1364_v51, %v911_v53  ;;  %v1370_v10 = vmul.f32 -1.442695, %v925_v16  ;;  %v1368_v11 = vmul.f32 -1.442695, %v923_v0  ;;  %v920_v13 = vadd.f32 %v1364_v51, %v905_v61  ;;  %v1373_v9 = vld [vmem:[%s1953_s2] ss:$0 sm:$0xff] }
 0x225   : > { %v1369_v12 = vmul.f32 -1.442695, %v924_v14  ;;  %v1367_v28 = vmul.f32 -1.442695, %v922_v1  ;;  %v1366_v31 = vmul.f32 -1.442695, %v921_v63  ;;  %vm981_vm13 = vcmp.eq.s32.totalorder %v1748_v20, %v1373_v9 }
 0x226   : > { %v1371_v19 = vmul.f32 -1.442695, %v926_v2  ;;  %v1365_v32 = vmul.f32 -1.442695, %v920_v13  ;;  %v1374_v24 = vsel %vm981_vm13, 1.0, %v1631_v54 }
 0x227   : > { %v912_v47 = vld [vmem:[#allocation2 + $0x38] sm:$0xff]  ;;  %v1058_v25 = vld [vmem:[%s1957_s6] sm:$0x1f] }
 0x228   : > { %v927_v57 = vadd.f32 %v1364_v51, %v912_v47  ;;  %1511 = vmatpush3.msk.msra.mxu1 %vm1069_vm15, %v1058_v25  ;;  %v1149_v29 = vld [vmem:[%s1959_s8] sm:$0x1f] }
 0x229   : > { %1515 = vmatprep.subr.mxu1 %v1631_v54  ;;  %v1376_v30 = vld [vmem:[%s1958_s7] ss:$0 sm:$0xff] }
 0x22a   : > { %v1372_v15 = vmul.f32 -1.442695, %v927_v57  ;;  %v1380_v47 = vld [vmem:[%s1960_s9] ss:$0 sm:$0xff] }
 0x22c   : > { %1557 = vpow2.f32 %v1372_v15 }
 0x22d   : > { %1559 = vpow2.f32 %v1371_v19 }
 0x22e   : > { %1561 = vpow2.f32 %v1370_v10 }
 0x22f   : > { %1563 = vpow2.f32 %v1369_v12 }
 0x230   : > { %1565 = vpow2.f32 %v1368_v11 }
 0x231   : > { %1567 = vpow2.f32 %v1367_v28 }
 0x232   : > { %1569 = vpow2.f32 %v1366_v31 }
 0x233   : > { %1571 = vpow2.f32 %v1365_v32 }
 0x239   : > { %v1558_v42 = vpop.eup %1557 }
 0x23a   : > { %v1560_v45 = vpop.eup %1559  ;;  %v959_v35 = vadd.f32 1.0, %v1558_v42 }
 0x23b   : > { %v1562_v46 = vpop.eup %1561  ;;  %v958_v48 = vadd.f32 1.0, %v1560_v45 }
 0x23c   : > { %v1564_v36 = vpop.eup %1563  ;;  %1573 = vrcp.f32 %v959_v35  ;;  %v957_v49 = vadd.f32 1.0, %v1562_v46 }
 0x23d   : > { %v1566_v50 = vpop.eup %1565  ;;  %1575 = vrcp.f32 %v958_v48  ;;  %v956_v39 = vadd.f32 1.0, %v1564_v36 }
 0x23e   : > { %v1568_v52 = vpop.eup %1567  ;;  %1577 = vrcp.f32 %v957_v49  ;;  %v955_v40 = vadd.f32 1.0, %v1566_v50 }
 0x23f   : > { %v1570_v27 = vpop.eup %1569  ;;  %1579 = vrcp.f32 %v956_v39  ;;  %v954_v55 = vadd.f32 1.0, %v1568_v52 }
 0x240   : > { %v1572_v56 = vpop.eup %1571  ;;  %1581 = vrcp.f32 %v955_v40  ;;  %v953_v58 = vadd.f32 1.0, %v1570_v27 }
 0x241   : > { %1583 = vrcp.f32 %v954_v55  ;;  %v952_v59 = vadd.f32 1.0, %v1572_v56 }
 0x242   : > { %1585 = vrcp.f32 %v953_v58 }
 0x243   : > { %1587 = vrcp.f32 %v952_v59 }
 0x249   : > { %v1574_v60 = vpop.eup %1573 }
 0x24a   : > { %v1576_v62 = vpop.eup %1575  ;;  %1492 = vmatpush3.msra.mxu0 %v1574_v60 }
 0x24b   : > { %v1578_v6 = vpop.eup %1577  ;;  %1493 = vmatprep.subr.mxu0 %v1631_v54 }
 0x24c   : > { %1494 = vmatpush3.msra.mxu0 %v1576_v62  ;;  %v1580_v7 = vpop.eup %1579 }
 0x24d   : > { %1495 = vmatprep.subr.mxu0 %v1631_v54  ;;  %v1582_v8 = vpop.eup %1581 }
 0x24e   : > { %1496 = vmatpush3.msra.mxu0 %v1578_v6  ;;  %v1584_v21 = vpop.eup %1583 }
 0x24f   : > { %1497 = vmatprep.subr.mxu0 %v1631_v54  ;;  %v1586_v22 = vpop.eup %1585 }
 0x250   : > { %1498 = vmatpush3.msra.mxu0 %v1580_v7  ;;  %v1588_v23 = vpop.eup %1587 }
 0x251   : > { %1499 = vmatprep.subr.mxu0 %v1631_v54 }
 0x252   : > { %1500 = vmatpush3.msra.mxu0 %v1582_v8 }
 0x253   : > { %1501 = vmatprep.subr.mxu0 %v1631_v54 }
 0x254   : > { %1502 = vmatpush3.msra.mxu0 %v1584_v21 }
 0x255   : > { %1503 = vmatprep.subr.mxu0 %v1631_v54 }
 0x256   : > { %1504 = vmatpush3.msra.mxu0 %v1586_v22 }
 0x257   : > { %1505 = vmatprep.subr.mxu0 %v1631_v54 }
 0x258   : > { %1506 = vmatpush3.msra.mxu0 %v1588_v23 }
 0x259   : > { %1508 = vmatmul.mubr.msk.f32.vlgmr.msra.gmra.mxu0 %vm984_vm14, %v1374_v24 }
 0x319   : > { %v1054_v20 = vpop.f32.mrf.mxu0 }
 0x31a   : > { %1513 = vmatmul.mubr.msk.f32.vlgmr.msra.gmra.mxu1 %vm892_vm8, %v1054_v20 }
 0x31b   : > { %v1509_v26 = vpop.f32.mrf.mxu0  ;;  %1517 = vmatprep.mubr.msk.f32.mxu1 %vm1632_vm12, %v1631_v54  ;;  %1516 = vmatpush3.msk.msra.mxu1 %vm1069_vm15, %v1149_v29 }
 0x3da   : > { %v1139_v33 = vpop.f32.mrf.mxu1 }
 0x3db   : > { %v1140_v34 = vadd.f32 %v1376_v30, %v1139_v33 }
 0x3dc   : > { %v1514_v37 = vpop.f32.mrf.mxu1 }
 0x3dd   : > { %v1379_v38 = vmul.f32 -1.442695, %v1140_v34 }
 0x3df   : > { %1589 = vpow2.f32 %v1379_v38 }
 0x3ec   : > { %v1590_v41 = vpop.eup %1589 }
 0x3ed   : > { %v1146_v43 = vadd.f32 1.0, %v1590_v41 }
 0x3ef   : > { %1591 = vrcp.f32 %v1146_v43 }
 0x3fc   : > { %v1592_v44 = vpop.eup %1591 }
 0x3fd   : > { %1518 = vmatmul.mubr.msk.f32.vlgmr.msra.gmra.mxu1 %vm892_vm8, %v1592_v44 }
 0x4bd   : > { %v1229_v51 = vpop.f32.mrf.mxu1 }
 0x4be   : > { %v1230_v53 = vadd.f32 %v1380_v47, %v1229_v51 }
 0x4bf   : > { %v1519_v54 = vpop.f32.mrf.mxu1 }
 0x4c0   : > { %1233 = vst [vmem:[#allocation3] sm:$0xf] %v1230_v53 }
 0x4c1 PF: > { %p1525_p7 = scmp.eq.s32.totalorder %s1695_s14, 2  ;;  %s1633_s24 = smov [#allocation3]  }
 0x4c2   : > { %s1241_s25 = sshll.u32 %s1633_s24, 4  ;;  %s1242_s25 = int_to_ptr.vmem [resolvable:$true] %s1241_s25 }
 0x4c3   : > { %s1593_s26 = scalar_lea.vmem %s1242_s25, 64  ;;  %p1600_p11 = scmp.lt.s32.totalorder %s1242_s25, %s1242_s25 }
 0x4c4   : > { %p1594_p8 = scmp.ne.s32.totalorder %s1242_s25, %s1593_s26  ;;  %p1601_p12 = scmp.lt.s32.totalorder %s1593_s26, %s1593_s26 }
 0x4c6   : > { %p1595_p9 = pnand %p1594_p8, %p1525_p7  ;;  %p1602_p13 = por %p1601_p12, %p1600_p11 }
 0x4c8   : > { %p1596_p10 = pneg %p1595_p9 }
 0x4ca   : > { %p1603_p0 = pnand %p1602_p13, %p1596_p10 }
 0x4cc   : > { %1606 = shalt.err (!%p1603_p0)
}
 0x4cd   : > { %1522 = dma.vmem_to_hbm [thread:$0]  (%p1525_p7), %s1242_s25, 64, %s1961_s10, [#allocation4]  }
 0x4ce   : > { %1622 = dma.done.wait (%p1525_p7), [#allocation4], 64  }
 0x4cf   : > { %1624 = vsyncadd (%p1525_p7), [#allocation4], 4294967232 }
 0x4d0 PF: > { %s21_s13 = sadd.s32 1, %s1627_s13  }
 0x4d1   : > { %p18_p1 = scmp.ge.s32.totalorder %s21_s13, 5  }
 0x4d3   :  { %20 = sbr.rel (!%p18_p1) target bundleno = 1 (0x1), region = 98 }
 0x4d8   :  { %1254 = vsyncpa [#allocation4], 1 }
 0x4d9   :  { %1256 = vsyncpa [#allocation4 + $0x1], 1 }

</bundles_post_ra>
